<compile_context>
chip_gen: v5e
topology: v5e:2x2
jax: 0.10.0
libtpu: 0.0.40
codegen_flags: <defaults>
</compile_context>

<pallas_src>
import math

import jax
import jax.numpy as jnp
from jax.experimental import pallas as pl
from jax.experimental.pallas import tpu as pltpu

# ----------------------------- config ----------------------------------------
B = 2                 # batch
T = 8                 # block_size / sequence length
C = 32                # n_embd
N_HEAD = 4            # n_head
D_HEAD = C // N_HEAD  # 8
BT = B * T            # 16 rows, processed in a single kernel step
NEG = -1e30           # finite "-inf": robust even for fully-masked rows / bf16 reuse

assert T & (T - 1) == 0, "block-diagonal mask uses a power-of-two trick for T"


# ------------------------------ kernel ----------------------------------------
def attn_kernel(x_ref, wqkv_ref, wp_ref, b_ref, o_ref):
    """Fused causal MHSA over all B*T rows in one shot.

    x_ref:    (B*T, C)   activations, batch folded into rows
    wqkv_ref: (C, 3C)    fused [Wq * 1/sqrt(d_head) | Wk | Wv], (in, out) layout
    wp_ref:   (C, C)     output projection, (in, out) layout
    b_ref:    (1, 4C)    packed [bq * 1/sqrt(d_head) | bk | bv | bproj]  (128 lanes)
    o_ref:    (B*T, C)   output
    """
    x = x_ref[...]                                                       # (BT, C)
    b_all = b_ref[...]                                                   # (1, 4C)

    # Single fused QKV projection (scale already folded into the q columns).
    qkv = jnp.dot(x, wqkv_ref[...], preferred_element_type=jnp.float32) \
        + b_all[:, :3 * C]                                               # (BT, 3C)

    # Build (N_HEAD, BT, D_HEAD) stacks so each of QK^T and att@V is a single
    # batched contraction over all heads (MXU packs the tiny per-head matmuls).
    def heads(base):
        return jnp.stack(
            [qkv[:, base + h * D_HEAD: base + (h + 1) * D_HEAD] for h in range(N_HEAD)],
            axis=0)

    q_h, k_h, v_h = heads(0), heads(C), heads(2 * C)                     # (H, BT, D)

    # Block-diagonal causal mask over the flattened row axis: a query row may
    # only attend to keys of the SAME batch element at positions <= its own.
    row = jax.lax.broadcasted_iota(jnp.int32, (BT, BT), 0)
    col = jax.lax.broadcasted_iota(jnp.int32, (BT, BT), 1)
    row_block_start = jnp.bitwise_and(row, jnp.int32(-T))   # T is a power of two
    mask = jnp.logical_and(row >= col, col >= row_block_start)

    # Batched QK^T (scale pre-folded into q), masked softmax, batched att@V.
    att = jnp.einsum('hqd,hkd->hqk', q_h, k_h,
                     preferred_element_type=jnp.float32)                 # (H, BT, BT)
    att = jnp.where(mask[None], att, NEG)
    att = att - jnp.max(att, axis=-1, keepdims=True)
    e = jnp.exp(att)
    p = e / jnp.sum(e, axis=-1, keepdims=True)                           # softmax
    # attn_drop: identity (eval mode)

    y_h = jnp.einsum('hqk,hkd->hqd', p, v_h,
                     preferred_element_type=jnp.float32)                 # (H, BT, D)
    y = jnp.concatenate([y_h[h] for h in range(N_HEAD)], axis=-1)        # (BT, C)

    # Output projection + packed proj bias. resid_drop: identity (eval mode).
    o_ref[...] = jnp.dot(y, wp_ref[...], preferred_element_type=jnp.float32) \
        + b_all[:, 3 * C:]


# ------------------------------ wrapper ---------------------------------------
def causal_self_attention(x, kp):
    """x: (B, T, C) float32; kp: prepared kernel params (prepare_kernel_params)."""
    x2 = x.reshape(BT, C)   # fold batch into rows (wrapper-side, free)
    out = pl.pallas_call(
        attn_kernel,
        out_shape=jax.ShapeDtypeStruct((BT, C), jnp.float32),
        grid=(1,),  # single step: whole (tiny) working set lives in VMEM
        in_specs=[
            pl.BlockSpec((BT, C), lambda i: (0, 0)),        # x (all rows)
            pl.BlockSpec((C, 3 * C), lambda i: (0, 0)),     # fused Wqkv
            pl.BlockSpec((C, C), lambda i: (0, 0)),         # Wproj
            pl.BlockSpec((1, 4 * C), lambda i: (0, 0)),     # packed biases (128 lanes)
        ],
        out_specs=pl.BlockSpec((BT, C), lambda i: (0, 0)),
        compiler_params=pltpu.CompilerParams(dimension_semantics=("arbitrary",)),
    )(x2, kp["wqkv"], kp["wp"], kp["bias"])
    return out.reshape(B, T, C)


# ------------------------------ parameters ------------------------------------
def init_params(key):
    """Raw params matching the PyTorch module's four Linear layers.
    Weights are stored transposed, i.e. (in, out), so y = x @ W + b."""
    ks = jax.random.split(key, 8)
    w = lambda k: jax.random.normal(k, (C, C), jnp.float32) / math.sqrt(C)
    b = lambda k: 0.01 * jax.random.normal(k, (1, C), jnp.float32)
    return {
        "wq": w(ks[0]), "bq": b(ks[1]),
        "wk": w(ks[2]), "bk": b(ks[3]),
        "wv": w(ks[4]), "bv": b(ks[5]),
        "wp": w(ks[6]), "bp": b(ks[7]),
    }


def prepare_kernel_params(p):
    """One-time prep: fuse QKV, fold 1/sqrt(d_head) into q, pack all biases."""
    scale = 1.0 / math.sqrt(D_HEAD)
    wqkv = jnp.concatenate([p["wq"] * scale, p["wk"], p["wv"]], axis=1)            # (C, 3C)
    bias = jnp.concatenate([p["bq"] * scale, p["bk"], p["bv"], p["bp"]], axis=1)   # (1, 4C)
    return {"wqkv": wqkv, "wp": p["wp"], "bias": bias}


# --------------------------- pure-JAX reference --------------------------------
def reference_attention(x, p):
    """Mirrors CausalSelfAttention.forward (dropout = identity)."""
    q = x @ p["wq"] + p["bq"]
    k = x @ p["wk"] + p["bk"]
    v = x @ p["wv"] + p["bv"]
    q = q.reshape(B, T, N_HEAD, D_HEAD).transpose(0, 2, 1, 3)
    k = k.reshape(B, T, N_HEAD, D_HEAD).transpose(0, 2, 1, 3)
    v = v.reshape(B, T, N_HEAD, D_HEAD).transpose(0, 2, 1, 3)
    att = (q @ k.transpose(0, 1, 3, 2)) / math.sqrt(D_HEAD)
    mask = jnp.tril(jnp.ones((T, T), bool))
    att = jnp.where(mask[None, None], att, -jnp.inf)
    att = jax.nn.softmax(att, axis=-1)
    y = (att @ v).transpose(0, 2, 1, 3).reshape(B, T, C)
    return y @ p["wp"] + p["bp"]


if __name__ == "__main__":
    key = jax.random.PRNGKey(0)
    kx, kp_key = jax.random.split(key)
    x = jax.random.normal(kx, (B, T, C), jnp.float32)

    params = init_params(kp_key)
    kparams = prepare_kernel_params(params)   # param prep, not per-call

    out = jax.block_until_ready(causal_self_attention(x, kparams))
    ref = reference_attention(x, params)

    assert out.shape == (B, T, C)
    max_err = float(jnp.max(jnp.abs(out - ref)))
    assert jnp.allclose(out, ref, atol=1e-4, rtol=1e-4), max_err

    print("KERNEL_OK")
</pallas_src>

<mosaic_0001>
module attributes {stable_mosaic.version = 11 : i64} {
  func.func @attn_kernel(%arg0: i32, %arg1: memref<16x32xf32, #tpu.memory_space<vmem>>, %arg2: memref<32x96xf32, #tpu.memory_space<vmem>>, %arg3: memref<32x32xf32, #tpu.memory_space<vmem>>, %arg4: memref<1x128xf32, #tpu.memory_space<vmem>>, %arg5: memref<16x32xf32, #tpu.memory_space<vmem>>) attributes {dimension_semantics = [#tpu.dimension_semantics<arbitrary>], iteration_bounds = array<i64: 1>, scalar_prefetch = 0 : i64, scratch_operands = 0 : i64, tpu.core_type = #tpu.core_type<tc>, window_params = [{pipeline_mode = #tpu.pipeline_mode<synchronous>, transform_indices = @transform_0, window_bounds = array<i64: 16, 32>}, {pipeline_mode = #tpu.pipeline_mode<synchronous>, transform_indices = @transform_1, window_bounds = array<i64: 32, 96>}, {pipeline_mode = #tpu.pipeline_mode<synchronous>, transform_indices = @transform_2, window_bounds = array<i64: 32, 32>}, {pipeline_mode = #tpu.pipeline_mode<synchronous>, transform_indices = @transform_3, window_bounds = array<i64: 1, 128>}, {pipeline_mode = #tpu.pipeline_mode<synchronous>, transform_indices = @transform_4, window_bounds = array<i64: 16, 32>}]} {
    %c0 = arith.constant 0 : index
    %c0_0 = arith.constant 0 : index
    %0 = vector.load %arg1[%c0, %c0_0] : memref<16x32xf32, #tpu.memory_space<vmem>>, vector<16x32xf32>
    %c0_1 = arith.constant 0 : index
    %c0_2 = arith.constant 0 : index
    %1 = vector.load %arg4[%c0_1, %c0_2] : memref<1x128xf32, #tpu.memory_space<vmem>>, vector<1x128xf32>
    %c0_3 = arith.constant 0 : index
    %c0_4 = arith.constant 0 : index
    %2 = vector.load %arg2[%c0_3, %c0_4] : memref<32x96xf32, #tpu.memory_space<vmem>>, vector<32x96xf32>
    %cst = arith.constant dense<0.000000e+00> : vector<16x96xf32>
    %3 = tpu.matmul %0, %2, %cst {dimension_numbers = #tpu.dot_dimension_numbers<[1], [0], [0], [1], [0, 0, 1, 1], [], []>} : vector<16x32xf32>, vector<32x96xf32>, vector<16x96xf32> -> vector<16x96xf32>
    %4 = vector.extract_strided_slice %1 {offsets = [0, 0], sizes = [1, 96], strides = [1, 1]} : vector<1x128xf32> to vector<1x96xf32>
    %5 = vector.broadcast %4 : vector<1x96xf32> to vector<16x96xf32>
    %6 = arith.addf %3, %5 : vector<16x96xf32>
    %7 = vector.extract_strided_slice %6 {offsets = [0, 0], sizes = [16, 8], strides = [1, 1]} : vector<16x96xf32> to vector<16x8xf32>
    %8 = vector.extract_strided_slice %6 {offsets = [0, 8], sizes = [16, 8], strides = [1, 1]} : vector<16x96xf32> to vector<16x8xf32>
    %9 = vector.extract_strided_slice %6 {offsets = [0, 16], sizes = [16, 8], strides = [1, 1]} : vector<16x96xf32> to vector<16x8xf32>
    %10 = vector.extract_strided_slice %6 {offsets = [0, 24], sizes = [16, 8], strides = [1, 1]} : vector<16x96xf32> to vector<16x8xf32>
    %11 = vector.shape_cast %7 : vector<16x8xf32> to vector<1x16x8xf32>
    %12 = vector.shape_cast %8 : vector<16x8xf32> to vector<1x16x8xf32>
    %13 = vector.shape_cast %9 : vector<16x8xf32> to vector<1x16x8xf32>
    %14 = vector.shape_cast %10 : vector<16x8xf32> to vector<1x16x8xf32>
    %15 = tpu.concatenate %11, %12, %13, %14 in 0 : vector<1x16x8xf32>, vector<1x16x8xf32>, vector<1x16x8xf32>, vector<1x16x8xf32> -> vector<4x16x8xf32>
    %16 = vector.extract_strided_slice %6 {offsets = [0, 32], sizes = [16, 8], strides = [1, 1]} : vector<16x96xf32> to vector<16x8xf32>
    %17 = vector.extract_strided_slice %6 {offsets = [0, 40], sizes = [16, 8], strides = [1, 1]} : vector<16x96xf32> to vector<16x8xf32>
    %18 = vector.extract_strided_slice %6 {offsets = [0, 48], sizes = [16, 8], strides = [1, 1]} : vector<16x96xf32> to vector<16x8xf32>
    %19 = vector.extract_strided_slice %6 {offsets = [0, 56], sizes = [16, 8], strides = [1, 1]} : vector<16x96xf32> to vector<16x8xf32>
    %20 = vector.shape_cast %16 : vector<16x8xf32> to vector<1x16x8xf32>
    %21 = vector.shape_cast %17 : vector<16x8xf32> to vector<1x16x8xf32>
    %22 = vector.shape_cast %18 : vector<16x8xf32> to vector<1x16x8xf32>
    %23 = vector.shape_cast %19 : vector<16x8xf32> to vector<1x16x8xf32>
    %24 = tpu.concatenate %20, %21, %22, %23 in 0 : vector<1x16x8xf32>, vector<1x16x8xf32>, vector<1x16x8xf32>, vector<1x16x8xf32> -> vector<4x16x8xf32>
    %25 = vector.extract_strided_slice %6 {offsets = [0, 64], sizes = [16, 8], strides = [1, 1]} : vector<16x96xf32> to vector<16x8xf32>
    %26 = vector.extract_strided_slice %6 {offsets = [0, 72], sizes = [16, 8], strides = [1, 1]} : vector<16x96xf32> to vector<16x8xf32>
    %27 = vector.extract_strided_slice %6 {offsets = [0, 80], sizes = [16, 8], strides = [1, 1]} : vector<16x96xf32> to vector<16x8xf32>
    %28 = vector.extract_strided_slice %6 {offsets = [0, 88], sizes = [16, 8], strides = [1, 1]} : vector<16x96xf32> to vector<16x8xf32>
    %29 = vector.shape_cast %25 : vector<16x8xf32> to vector<1x16x8xf32>
    %30 = vector.shape_cast %26 : vector<16x8xf32> to vector<1x16x8xf32>
    %31 = vector.shape_cast %27 : vector<16x8xf32> to vector<1x16x8xf32>
    %32 = vector.shape_cast %28 : vector<16x8xf32> to vector<1x16x8xf32>
    %33 = tpu.concatenate %29, %30, %31, %32 in 0 : vector<1x16x8xf32>, vector<1x16x8xf32>, vector<1x16x8xf32>, vector<1x16x8xf32> -> vector<4x16x8xf32>
    %34 = tpu.iota {dimensions = array<i32: 0>} : vector<16x16xi32>
    %35 = tpu.iota {dimensions = array<i32: 1>} : vector<16x16xi32>
    %c-8_i32 = arith.constant -8 : i32
    %36 = vector.broadcast %c-8_i32 : i32 to vector<16x16xi32>
    %37 = arith.andi %34, %36 : vector<16x16xi32>
    %38 = arith.cmpi sge, %34, %35 : vector<16x16xi32>
    %39 = arith.cmpi sge, %35, %37 : vector<16x16xi32>
    %40 = arith.andi %38, %39 : vector<16x16xi1>
    "tpu.trace_start"() <{level = 10 : i32, message = "hqd,hkd->hqk"}> : () -> ()
    %cst_5 = arith.constant dense<0.000000e+00> : vector<4x16x16xf32>
    %41 = tpu.matmul %15, %24, %cst_5 {dimension_numbers = #tpu.dot_dimension_numbers<[2], [2], [1], [1], [0, 0, 0, 1, 1, 1], [0], [0]>} : vector<4x16x8xf32>, vector<4x16x8xf32>, vector<4x16x16xf32> -> vector<4x16x16xf32>
    "tpu.trace_stop"() : () -> ()
    %42 = vector.shape_cast %40 : vector<16x16xi1> to vector<1x16x16xi1>
    %cst_6 = arith.constant -1.000000e+30 : f32
    %43 = vector.shape_cast %42 : vector<1x16x16xi1> to vector<1x16x16xi1>
    %44 = vector.broadcast %43 : vector<1x16x16xi1> to vector<4x16x16xi1>
    %45 = vector.broadcast %cst_6 : f32 to vector<4x16x16xf32>
    %46 = arith.select %44, %41, %45 : vector<4x16x16xi1>, vector<4x16x16xf32>
    %cst_7 = arith.constant dense<0xFF800000> : vector<4x16xf32>
    %47 = vector.multi_reduction <maximumf>, %46, %cst_7 [2] : vector<4x16x16xf32> to vector<4x16xf32>
    %48 = vector.shape_cast %47 : vector<4x16xf32> to vector<4x16x1xf32>
    %49 = vector.broadcast %48 : vector<4x16x1xf32> to vector<4x16x16xf32>
    %50 = arith.subf %46, %49 : vector<4x16x16xf32>
    %51 = math.exp %50 : vector<4x16x16xf32>
    %cst_8 = arith.constant dense<0.000000e+00> : vector<4x16xf32>
    %52 = vector.multi_reduction <add>, %51, %cst_8 [2] : vector<4x16x16xf32> to vector<4x16xf32>
    %53 = vector.shape_cast %52 : vector<4x16xf32> to vector<4x16x1xf32>
    %54 = vector.broadcast %53 : vector<4x16x1xf32> to vector<4x16x16xf32>
    %55 = arith.divf %51, %54 : vector<4x16x16xf32>
    "tpu.trace_start"() <{level = 10 : i32, message = "hqk,hkd->hqd"}> : () -> ()
    %cst_9 = arith.constant dense<0.000000e+00> : vector<4x16x8xf32>
    %56 = tpu.matmul %55, %33, %cst_9 {dimension_numbers = #tpu.dot_dimension_numbers<[2], [1], [1], [2], [0, 0, 0, 1, 1, 2], [0], [0]>} : vector<4x16x16xf32>, vector<4x16x8xf32>, vector<4x16x8xf32> -> vector<4x16x8xf32>
    "tpu.trace_stop"() : () -> ()
    %57 = vector.extract_strided_slice %56 {offsets = [0, 0, 0], sizes = [1, 16, 8], strides = [1, 1, 1]} : vector<4x16x8xf32> to vector<1x16x8xf32>
    %58 = vector.shape_cast %57 : vector<1x16x8xf32> to vector<16x8xf32>
    %59 = vector.extract_strided_slice %56 {offsets = [1, 0, 0], sizes = [1, 16, 8], strides = [1, 1, 1]} : vector<4x16x8xf32> to vector<1x16x8xf32>
    %60 = vector.shape_cast %59 : vector<1x16x8xf32> to vector<16x8xf32>
    %61 = vector.extract_strided_slice %56 {offsets = [2, 0, 0], sizes = [1, 16, 8], strides = [1, 1, 1]} : vector<4x16x8xf32> to vector<1x16x8xf32>
    %62 = vector.shape_cast %61 : vector<1x16x8xf32> to vector<16x8xf32>
    %63 = vector.extract_strided_slice %56 {offsets = [3, 0, 0], sizes = [1, 16, 8], strides = [1, 1, 1]} : vector<4x16x8xf32> to vector<1x16x8xf32>
    %64 = vector.shape_cast %63 : vector<1x16x8xf32> to vector<16x8xf32>
    %65 = tpu.concatenate %58, %60, %62, %64 in 1 : vector<16x8xf32>, vector<16x8xf32>, vector<16x8xf32>, vector<16x8xf32> -> vector<16x32xf32>
    %c0_10 = arith.constant 0 : index
    %c0_11 = arith.constant 0 : index
    %66 = vector.load %arg3[%c0_10, %c0_11] : memref<32x32xf32, #tpu.memory_space<vmem>>, vector<32x32xf32>
    %cst_12 = arith.constant dense<0.000000e+00> : vector<16x32xf32>
    %67 = tpu.matmul %65, %66, %cst_12 {dimension_numbers = #tpu.dot_dimension_numbers<[1], [0], [0], [1], [0, 0, 1, 1], [], []>} : vector<16x32xf32>, vector<32x32xf32>, vector<16x32xf32> -> vector<16x32xf32>
    %68 = vector.extract_strided_slice %1 {offsets = [0, 96], sizes = [1, 32], strides = [1, 1]} : vector<1x128xf32> to vector<1x32xf32>
    %69 = vector.broadcast %68 : vector<1x32xf32> to vector<16x32xf32>
    %70 = arith.addf %67, %69 : vector<16x32xf32>
    %c0_13 = arith.constant 0 : index
    %c0_14 = arith.constant 0 : index
    %71 = vector.load %arg5[%c0_13, %c0_14] : memref<16x32xf32, #tpu.memory_space<vmem>>, vector<16x32xf32>
    tpu.vector_store %arg5[%c0_13, %c0_14], %70 {strides = array<i32>} : memref<16x32xf32, #tpu.memory_space<vmem>>, vector<16x32xf32>,
    return
  }
  func.func @transform_0(%arg0: i32) -> (i32, i32) {
    %c0_i32 = arith.constant 0 : i32
    %c0_i32_0 = arith.constant 0 : i32
    %c0_i32_1 = arith.constant 0 : i32
    return %c0_i32, %c0_i32_0 : i32, i32
  }
  func.func @transform_1(%arg0: i32) -> (i32, i32) {
    %c0_i32 = arith.constant 0 : i32
    %c0_i32_0 = arith.constant 0 : i32
    %c0_i32_1 = arith.constant 0 : i32
    return %c0_i32, %c0_i32_0 : i32, i32
  }
  func.func @transform_2(%arg0: i32) -> (i32, i32) {
    %c0_i32 = arith.constant 0 : i32
    %c0_i32_0 = arith.constant 0 : i32
    %c0_i32_1 = arith.constant 0 : i32
    return %c0_i32, %c0_i32_0 : i32, i32
  }
  func.func @transform_3(%arg0: i32) -> (i32, i32) {
    %c0_i32 = arith.constant 0 : i32
    %c0_i32_0 = arith.constant 0 : i32
    %c0_i32_1 = arith.constant 0 : i32
    return %c0_i32, %c0_i32_0 : i32, i32
  }
  func.func @transform_4(%arg0: i32) -> (i32, i32) {
    %c0_i32 = arith.constant 0 : i32
    %c0_i32_0 = arith.constant 0 : i32
    %c0_i32_1 = arith.constant 0 : i32
    return %c0_i32, %c0_i32_0 : i32, i32
  }
}

</mosaic_0001>

<bundles_post_ra>
// kernel: tpu_custom_call.1
= control target key start
LH: loop header
LB: loop body
LE: loop exit
PB: predicated region body
PF: predicated region fallthrough
CT: control target
= control target key end

     0   :  { %9 = vsyncpa [#allocation3], 0  ;;  %s1225_s0 = inlined_call_operand.hbm [shape: f32[16,32], index: 0, kind: input, shape index: {}]   ;;  %s1226_s1 = inlined_call_operand.hbm [shape: f32[32,96], index: 1, kind: input, shape index: {}]   ;;  %s1227_s2 = inlined_call_operand.hbm [shape: f32[32,32], index: 2, kind: input, shape index: {}]   ;;  %s1228_s3 = inlined_call_operand.vmem [shape: f32[1,128], index: 3, kind: input, shape index: {}]   ;;  %s1229_s4 = inlined_call_operand.hbm [shape: f32[16,32], index: 4, kind: output, shape index: {}]  }
   0x1   :  { %10 = vsyncpa [#allocation6], 0 }
   0x2   :  { %11 = vsyncpa [#allocation4], 0  ;;  %s29_s17 = sshll.u32 %s1226_s1, 4  ;;  %s910_s18 = smov [#allocation5]   ;;  %s30_s17 = int_to_ptr.hbm [resolvable:$true] %s29_s17 }
   0x3   :  { %s31_s19 = sshll.u32 %s910_s18, 4  ;;  %s16_s22 = sshll.u32 %s1225_s0, 4  ;;  %s32_s19 = int_to_ptr.vmem [resolvable:$true] %s31_s19  ;;  %s17_s22 = int_to_ptr.hbm [resolvable:$true] %s16_s22 }
   0x4   :  { %s911_s23 = smov 128   ;;  %s912_s24 = smov 8  }
   0x5   :  { %37 = dma.hbm_to_vmem [thread:$0]  %s30_s17, 512, %s32_s19, [#allocation6], %s911_s23, %s911_s23, %s912_s24  }
   0x6   :  { %s913_s25 = smov [#allocation2]   ;;  %s42_s1 = sshll.u32 %s1227_s2, 4  ;;  %s43_s1 = int_to_ptr.hbm [resolvable:$true] %s42_s1 }
   0x7   :  { %s18_s26 = sshll.u32 %s913_s25, 4  ;;  %s914_s0 = smov [#allocation7]   ;;  %s19_s26 = int_to_ptr.vmem [resolvable:$true] %s18_s26 }
   0x8   :  { %24 = dma.hbm_to_vmem [thread:$0]  %s17_s22, 256, %s19_s26, [#allocation3], %s911_s23, %s911_s23, %s912_s24  }
   0x9   :  { %s44_s29 = sshll.u32 %s914_s0, 4  ;;  %s45_s29 = int_to_ptr.vmem [resolvable:$true] %s44_s29 }
   0xa   :  { %50 = dma.hbm_to_vmem [thread:$0]  %s43_s1, 512, %s45_s29, [#allocation6], %s911_s23, %s911_s23, %s912_s24  }
   0xb   :  { %904 = dma.done.wait [#allocation3], 256  }
   0xc   :  { %905 = vsyncadd [#allocation3], 4294967040 }
   0xd   :  { %906 = dma.done.wait [#allocation6], 1024  }
   0xe   :  { %907 = vsyncadd [#allocation6], 4294966272  ;;  %v71_v0 = vld [vmem:[#allocation5 + $0x18] sm:$0xff]  ;;  %v70_v1 = vld [vmem:[#allocation5 + $0x10] sm:$0xff]  ;;  %vm75_vm0 = vcmask 261120   ;;  %s915_s5 = smov 120   ;;  %v119_v25 = vlaneseq }
   0xf   :  { %94 = vmatpush.msra.mxu0 %v71_v0  ;;  %735 = vmatpush.msra.mxu2 %v71_v0  ;;  %v69_v2 = vld [vmem:[#allocation5 + $0x8] sm:$0xff]  ;;  %v68_v3 = vld [vmem:[#allocation5] sm:$0xff]  ;;  %v65_v4 = vld [vmem:[#allocation2] sm:$0xff]  ;;  %s916_s6 = smov 104   ;;  %s917_s7 = smov 112   ;;  %vm136_vm1 = vcmask 64512  }
  0x10   :  { %v66_v5 = vld [vmem:[#allocation2 + $0x8] sm:$0xff]  ;;  %v972_v6 = vld [vmem:[%s1228_s3] ss:$0 sm:$0xff]  ;;  %s918_s3 = smov 96   ;;  %v120_v26 = vshrl.u32 %v119_v25, 7  ;;  %v123_v27 = vand.u32 127, %v119_v25 }
  0x11   :  { %95 = vmatpush.msra.mxu0 %v70_v1  ;;  %736 = vmatpush.msra.mxu2 %v70_v1  ;;  %vm285_vm3 = vcmask 130048   ;;  %s919_s8 = smov 64   ;;  %s920_s9 = smov 24  }
  0x12   :  { %v121_v28 = vadd.s32 8, %v120_v26  ;;  %vm126_vm2 = vcmp.ge.s32.totalorder %v120_v26, %v123_v27  ;;  %s921_s10 = smov 16   ;;  %s922_s11 = smov 32  }
  0x13   :  { %96 = vmatpush.msra.mxu0 %v69_v2  ;;  %737 = vmatpush.msra.mxu2 %v69_v2  ;;  %s923_s12 = smov [#allocation8]   ;;  %s693_s16 = sshll.u32 %s1229_s4, 4  ;;  %s694_s16 = int_to_ptr.hbm [resolvable:$true] %s693_s16 }
  0x14   :  { %v125_v30 = vand.u32 4294967288, %v121_v28  ;;  %vm127_vm4 = vcmp.ge.s32.totalorder %v121_v28, %v123_v27  ;;  %s691_s13 = sshll.u32 %s923_s12, 4  ;;  %s692_s13 = int_to_ptr.vmem [resolvable:$true] %s691_s13 }
  0x15   :  { %97 = vmatpush.msra.mxu0 %v68_v3  ;;  %738 = vmatpush.msra.mxu2 %v68_v3 }
  0x16   :  { %707 = vmatmul.msk.f32.vlgmr.msra.gmra.mxu0 %vm75_vm0, %v65_v4  ;;  %708 = vmatmul.msk.f32.vlgmr.msra.gmra.mxu2 %vm75_vm0, %v66_v5  ;;  %vm129_vm5 = vcmp.ge.s32.totalorder %v123_v27, %v125_v30 }
  0x17   :  { %vm1034_vm6 = vmand %vm127_vm4, %vm129_vm5 }
  0x93   :  { %v99_v7 = vpop.f32.mrf.mxu0 }
  0x94   :  { %v975_v8 = vadd.f32 %v972_v6, %v99_v7 }
  0x96   :  { %107 = vrot.lane.b32.xlu1 %v975_v8, %s915_s5 }
  0x99   :  { %v102_v9 = vpop.f32.mrf.mxu2 }
  0x9a   :  { %v979_v10 = vadd.f32 %v972_v6, %v102_v9 }
  0x9c   :  { %117 = vrot.lane.b32.xlu2 %v979_v10, %s916_s6  ;;  %109 = vrot.lane.b32.xlu0 %v979_v10, %s915_s5 }
  0x9e   :  { %111 = vrot.lane.b32.xlu1 %v975_v8, %s917_s7 }
  0xa4   :  { %113 = vrot.lane.b32.xlu0 %v979_v10, %s917_s7  ;;  %115 = vrot.lane.b32.xlu2 %v975_v8, %s916_s6 }
  0xa6   :  { %132 = vrot.lane.b32.xlu1 %v975_v8, %s918_s3 }
  0xac   :  { %134 = vrot.lane.b32.xlu0 %v979_v10, %s918_s3 }
  0xf6   :  { %v988_v11 = vpop.permute.xlu2 %117 }
  0xfe   :  { %v996_v14 = vpop.permute.xlu2 %115 }
 0x108   :  { %v990_v12 = vpop.permute.xlu1 %107 }
 0x109   :  { %168 = vrot.lane.b32.xlu1 %v990_v12, %s918_s3 }
 0x10e   :  { %v993_v13 = vpop.permute.xlu0 %109 }
 0x10f   :  { %170 = vrot.lane.b32.xlu2 %v993_v13, %s918_s3 }
 0x110   :  { %v999_v15 = vpop.permute.xlu1 %111 }
 0x111   :  { %238 = vrot.lane.b32.xlu1 %v996_v14, %s918_s3 }
 0x116   :  { %v1001_v16 = vpop.permute.xlu0 %113 }
 0x117   :  { %205 = vrot.lane.b32.xlu0 %v1001_v16, %s918_s3  ;;  %203 = vrot.lane.b32.xlu2 %v999_v15, %s918_s3  ;;  %v755_v30 = vpack.i.bf16 %v1001_v16, %v993_v13 }
 0x118   :  { %v133_v18 = vpop.permute.xlu1 %132 }
 0x11e   :  { %v135_v17 = vpop.permute.xlu0 %134 }
 0x11f   :  { %240 = vrot.lane.b32.xlu0 %v988_v11, %s918_s3  ;;  %709 = vmatpush.xpose.msk.msra.mxu1 %vm136_vm1, %v135_v17 }
 0x120   :  { %739 = vmatpush.xpose.msk.msra.mxu3 %vm136_vm1, %v135_v17 }
 0x123   :  { %710 = vmatpush.xpose.msk.msra.mxu1 %vm136_vm1, %v133_v18 }
 0x124   :  { %740 = vmatpush.xpose.msk.msra.mxu3 %vm136_vm1, %v133_v18 }
 0x126   :  { %711 = vmatmul.msk.f32.vlgmr.msra.gmra.mxu1 %vm136_vm1, %v975_v8 }
 0x127   :  { %712 = vmatmul.msk.f32.vlgmr.msra.gmra.mxu3 %vm136_vm1, %v979_v10 }
 0x169   :  { %v171_v19 = vpop.permute.xlu2 %170 }
 0x16a   :  { %713 = vmatpush.xpose.msk.msrb.mxu2 %vm136_vm1, %v171_v19 }
 0x171   :  { %v204_v22 = vpop.permute.xlu2 %203 }
 0x17b   :  { %v169_v20 = vpop.permute.xlu1 %168 }
 0x17c   :  { %714 = vmatpush.xpose.msk.msrb.mxu2 %vm136_vm1, %v169_v20 }
 0x17f   :  { %715 = vmatmul.msk.f32.vlgmr.msrb.gmra.mxu2 %vm136_vm1, %v990_v12 }
 0x183   :  { %v239_v24 = vpop.permute.xlu1 %238 }
 0x187   :  { %716 = vmatmul.msk.f32.gmra.mxu2 %vm136_vm1, %v993_v13 }
 0x189   :  { %v206_v21 = vpop.permute.xlu0 %205 }
 0x18a   :  { %717 = vmatpush.xpose.msk.msrb.mxu3 %vm136_vm1, %v206_v21 }
 0x18e   :  { %718 = vmatpush.xpose.msk.msrb.mxu3 %vm136_vm1, %v204_v22 }
 0x191   :  { %v241_v23 = vpop.permute.xlu0 %240  ;;  %719 = vmatmul.msk.f32.vlgmr.msrb.gmra.mxu3 %vm136_vm1, %v999_v15 }
 0x192   :  { %721 = vmatpush.xpose.msk.msrb.mxu0 %vm136_vm1, %v241_v23 }
 0x196   :  { %722 = vmatpush.xpose.msk.msrb.mxu0 %vm136_vm1, %v239_v24 }
 0x199   :  { %720 = vmatmul.msk.f32.gmra.mxu3 %vm136_vm1, %v1001_v16  ;;  %723 = vmatmul.msk.f32.vlgmr.msrb.gmra.mxu0 %vm136_vm1, %v996_v14 }
 0x1a1   :  { %724 = vmatmul.msk.f32.gmra.mxu0 %vm136_vm1, %v988_v11 }
 0x1a3   :  { %v162_v38 = vpop.f32.mrf.mxu1 }
 0x1a4   :  { %v1042_v39 = vsel %vm126_vm2, %v162_v38, -1e+30 }
 0x1a5   :  { %v286_v41 = vsel %vm285_vm3, %v1042_v39, -inf }
 0x1aa   :  { %v165_v36 = vpop.f32.mrf.mxu3 }
 0x1ab   :  { %v278_v53 = vsel %vm1034_vm6, %v165_v36, -1e+30 }
 0x1ac   :  { %v289_v54 = vsel %vm285_vm3, %v278_v53, -inf }
 0x202   :  { %v197_v29 = vpop.f32.mrf.mxu2 }
 0x203   :  { %v279_v31 = vsel %vm126_vm2, %v197_v29, -1e+30 }
 0x204   :  { %v292_v32 = vsel %vm285_vm3, %v279_v31, -inf }
 0x205   :  { %293 = vmax.xlane.f32.xlu2 %v292_v32  ;;  %v765_v32 = vpack.i.bf16 %v996_v14, %v988_v11 }
 0x20a   :  { %v200_v34 = vpop.f32.mrf.mxu2 }
 0x20b   :  { %v280_v35 = vsel %vm1034_vm6, %v200_v34, -1e+30 }
 0x20c   :  { %v295_v37 = vsel %vm285_vm3, %v280_v35, -inf }
 0x20d   :  { %296 = vmax.xlane.f32.xlu1 %v295_v37 }
 0x214   :  { %v232_v40 = vpop.f32.mrf.mxu3 }
 0x215   :  { %v281_v42 = vsel %vm126_vm2, %v232_v40, -1e+30  ;;  %287 = vmax.xlane.f32.xlu1 %v286_v41 }
 0x216   :  { %v267_v43 = vpop.f32.mrf.mxu0  ;;  %v298_v44 = vsel %vm285_vm3, %v281_v42, -inf }
 0x217   :  { %v283_v45 = vsel %vm126_vm2, %v267_v43, -1e+30  ;;  %299 = vmax.xlane.f32.xlu0 %v298_v44 }
 0x218   :  { %v304_v46 = vsel %vm285_vm3, %v283_v45, -inf }
 0x219   :  { %305 = vmax.xlane.f32.xlu2 %v304_v46 }
 0x21c   :  { %v235_v47 = vpop.f32.mrf.mxu3 }
 0x21d   :  { %v282_v48 = vsel %vm1034_vm6, %v235_v47, -1e+30 }
 0x21e   :  { %v270_v49 = vpop.f32.mrf.mxu0  ;;  %v301_v51 = vsel %vm285_vm3, %v282_v48, -inf }
 0x21f   :  { %v284_v50 = vsel %vm1034_vm6, %v270_v49, -1e+30 }
 0x220   :  { %v307_v52 = vsel %vm285_vm3, %v284_v50, -inf }
 0x221   :  { %302 = vmax.xlane.f32.xlu2 %v301_v51  ;;  %308 = vmax.xlane.f32.xlu0 %v307_v52 }
 0x229   :  { %290 = vmax.xlane.f32.xlu0 %v289_v54 }
 0x278   :  { %v294_v55 = vpop.xlane.xlu2 %293 }
 0x279   :  { %v312_v56 = vsub.f32 %v279_v31, %v294_v55  ;;  %v760_v31 = vpack.i.bf16 %v999_v15, %v990_v12 }
 0x27b   :  { %v322_v57 = vmul.f32 1.442695, %v312_v56 }
 0x27d   :  { %776 = vpow2.f32 %v322_v57 }
 0x280   :  { %v297_v5 = vpop.xlane.xlu1 %296 }
 0x281   :  { %v313_v21 = vsub.f32 %v280_v35, %v297_v5  ;;  %v770_v35 = vpack.i.bf16 %v975_v8, %v979_v10 }
 0x283   :  { %v1059_v58 = vpop.eup %776  ;;  %v324_v23 = vmul.f32 1.442695, %v313_v21 }
 0x284   :  { %v340_v59 = vsel %vm285_vm3, %v1059_v58, 0.0 }
 0x285   :  { %341 = vadd.xlane.f32.xlu2 %v340_v59 }
 0x288   :  { %v288_v33 = vpop.xlane.xlu1 %287 }
 0x289   :  { %v310_v34 = vsub.f32 %v1042_v39, %v288_v33 }
 0x28a   :  { %v300_v60 = vpop.xlane.xlu0 %299 }
 0x28b   :  { %v314_v61 = vsub.f32 %v281_v42, %v300_v60  ;;  %v318_v36 = vmul.f32 1.442695, %v310_v34 }
 0x28c   :  { %v306_v62 = vpop.xlane.xlu2 %305 }
 0x28d   :  { %v326_v63 = vmul.f32 1.442695, %v314_v61  ;;  %v316_v0 = vsub.f32 %v283_v45, %v306_v62 }
 0x28f   :  { %778 = vpow2.f32 %v326_v63  ;;  %v330_v1 = vmul.f32 1.442695, %v316_v0 }
 0x291   :  { %780 = vpow2.f32 %v330_v1 }
 0x294   :  { %v303_v2 = vpop.xlane.xlu2 %302  ;;  %v309_v3 = vpop.xlane.xlu0 %308 }
 0x295   :  { %v1063_v4 = vpop.eup %778  ;;  %v315_v7 = vsub.f32 %v282_v48, %v303_v2  ;;  %v317_v9 = vsub.f32 %v284_v50, %v309_v3 }
 0x296   :  { %v346_v17 = vsel %vm285_vm3, %v1063_v4, 0.0 }
 0x297   :  { %v1067_v18 = vpop.eup %780  ;;  %v328_v19 = vmul.f32 1.442695, %v315_v7  ;;  %v332_v20 = vmul.f32 1.442695, %v317_v9  ;;  %347 = vadd.xlane.f32.xlu1 %v346_v17 }
 0x298   :  { %v352_v22 = vsel %vm285_vm3, %v1067_v18, 0.0 }
 0x299   :  { %782 = vpow2.f32 %v328_v19  ;;  %353 = vadd.xlane.f32.xlu0 %v352_v22 }
 0x29a   :  { %784 = vpow2.f32 %v332_v20 }
 0x29b   :  { %786 = vpow2.f32 %v324_v23 }
 0x29c   :  { %788 = vpow2.f32 %v318_v36  ;;  %v291_v13 = vpop.xlane.xlu0 %290 }
 0x29d   :  { %v311_v16 = vsub.f32 %v278_v53, %v291_v13 }
 0x29f   :  { %v1071_v24 = vpop.eup %782  ;;  %v320_v38 = vmul.f32 1.442695, %v311_v16 }
 0x2a0   :  { %v1073_v25 = vpop.eup %784  ;;  %v349_v26 = vsel %vm285_vm3, %v1071_v24, 0.0 }
 0x2a1   :  { %350 = vadd.xlane.f32.xlu1 %v349_v26  ;;  %v355_v27 = vsel %vm285_vm3, %v1073_v25, 0.0  ;;  %v1079_v28 = vpop.eup %786  ;;  %790 = vpow2.f32 %v320_v38 }
 0x2a2   :  { %356 = vadd.xlane.f32.xlu2 %v355_v27  ;;  %v343_v29 = vsel %vm285_vm3, %v1079_v28, 0.0  ;;  %v1092_v37 = vpop.eup %788 }
 0x2a3   :  { %v334_v12 = vsel %vm285_vm3, %v1092_v37, 0.0 }
 0x2a7   :  { %v1096_v11 = vpop.eup %790 }
 0x2a8   :  { %v337_v14 = vsel %vm285_vm3, %v1096_v11, 0.0 }
 0x2aa   :  { %344 = vadd.xlane.f32.xlu2 %v343_v29 }
 0x2ad   :  { %756 = vrot.lane.b32.xlu0 %v755_v30, %s919_s8 }
 0x2ba   :  { %761 = vrot.lane.b32.xlu1 %v760_v31, %s919_s8 }
 0x2c2   :  { %766 = vrot.lane.b32.xlu2 %v765_v32, %s919_s8 }
 0x2ca   :  { %771 = vrot.lane.b32.xlu2 %v770_v35, %s919_s8 }
 0x2d7   :  { %335 = vadd.xlane.f32.xlu0 %v334_v12 }
 0x2e4   :  { %338 = vadd.xlane.f32.xlu1 %v337_v14 }
 0x2f8   :  { %v342_v8 = vpop.xlane.xlu2 %341 }
 0x2f9   :  { %792 = vrcp.f32 %v342_v8  ;;  %vm393_vm8 = vweird.f32 %v342_v8  ;;  %v399_v53 = vand.u32 2147483648, %v342_v8  ;;  %v397_v60 = vand.u32 2147483647, %v342_v8 }
 0x2fb   :  { %v400_v7 = vor.u32 1.1754944e-38, %v399_v53  ;;  %vm398_vm12 = vcmp.eq.f32.partialorder %v397_v60, 8.507059e+37 }
 0x2ff   :  { %v793_v10 = vpop.eup %792 }
 0x300   :  { %v389_v40 = vmul.f32 %v793_v10, %v342_v8  ;;  %vm394_vm7 = vweird.f32 %v793_v10 }
 0x301   :  { %vm1121_vm9 = vmor %vm393_vm8, %vm394_vm7 }
 0x302   :  { %v390_v42 = vsub.f32 1.0, %v389_v40 }
 0x304   :  { %v391_v47 = vmul.f32 %v793_v10, %v390_v42 }
 0x306   :  { %v392_v50 = vadd.f32 %v793_v10, %v391_v47 }
 0x308   :  { %v396_v61 = vsel %vm1121_vm9, %v793_v10, %v392_v50 }
 0x309   :  { %v401_v20 = vsel %vm398_vm12, %v400_v7, %v396_v61 }
 0x30a   :  { %v1100_v39 = vpop.xlane.xlu1 %347 }
 0x30b   :  { %vm423_vm14 = vweird.f32 %v1100_v39  ;;  %v427_v26 = vand.u32 2147483647, %v1100_v39  ;;  %v429_v33 = vand.u32 2147483648, %v1100_v39 }
 0x30c   :  { %v354_v15 = vpop.xlane.xlu0 %353 }
 0x30d   :  { %794 = vrcp.f32 %v354_v15  ;;  %v457_v1 = vand.u32 2147483647, %v354_v15  ;;  %v459_v2 = vand.u32 2147483648, %v354_v15  ;;  %vm453_vm11 = vweird.f32 %v354_v15 }
 0x30e   :  { %796 = vrcp.f32 %v1100_v39  ;;  %vm428_vm7 = vcmp.eq.f32.partialorder %v427_v26, 8.507059e+37 }
 0x30f   :  { %vm458_vm15 = vcmp.eq.f32.partialorder %v457_v1, 8.507059e+37  ;;  %v460_v27 = vor.u32 1.1754944e-38, %v459_v2 }
 0x313   :  { %v795_v41 = vpop.eup %794 }
 0x314   :  { %v449_v43 = vmul.f32 %v795_v41, %v354_v15  ;;  %v1105_v45 = vpop.xlane.xlu1 %350  ;;  %v1107_v46 = vpop.eup %796  ;;  %vm454_vm10 = vweird.f32 %v795_v41 }
 0x315   :  { %v1103_v44 = vpop.xlane.xlu2 %356  ;;  %v419_v49 = vmul.f32 %v1107_v46, %v1100_v39  ;;  %vm1131_vm13 = vmor %vm453_vm11, %vm454_vm10  ;;  %vm424_vm2 = vweird.f32 %v1107_v46  ;;  %v430_v39 = vor.u32 1.1754944e-38, %v429_v33  ;;  %v442_v61 = vand.u32 2147483647, %v1105_v45 }
 0x316   :  { %798 = vrcp.f32 %v1103_v44  ;;  %v450_v48 = vsub.f32 1.0, %v449_v43  ;;  %v474_v35 = vand.u32 2147483648, %v1103_v44  ;;  %v472_v38 = vand.u32 2147483647, %v1103_v44  ;;  %vm1153_vm5 = vmor %vm423_vm14, %vm424_vm2 }
 0x317   :  { %800 = vrcp.f32 %v1105_v45  ;;  %v420_v54 = vsub.f32 1.0, %v419_v49  ;;  %vm468_vm6 = vweird.f32 %v1103_v44 }
 0x318   :  { %v451_v51 = vmul.f32 %v795_v41, %v450_v48  ;;  %v475_v43 = vor.u32 1.1754944e-38, %v474_v35  ;;  %vm473_vm9 = vcmp.eq.f32.partialorder %v472_v38, 8.507059e+37 }
 0x319   :  { %v421_v9 = vmul.f32 %v1107_v46, %v420_v54 }
 0x31a   :  { %v452_v62 = vadd.f32 %v795_v41, %v451_v51 }
 0x31b   :  { %v422_v29 = vadd.f32 %v1107_v46, %v421_v9 }
 0x31c   :  { %v1113_v52 = vpop.eup %798  ;;  %v456_v21 = vsel %vm1131_vm13, %v795_v41, %v452_v62  ;;  %v402_v41 = vmul.f32 %v1059_v58, %v401_v20  ;;  %vm438_vm13 = vweird.f32 %v1105_v45 }
 0x31d   :  { %v464_v55 = vmul.f32 %v1113_v52, %v1103_v44  ;;  %v1117_v56 = vpop.xlane.xlu2 %344  ;;  %v1119_v57 = vpop.eup %800  ;;  %v461_v34 = vsel %vm458_vm15, %v460_v27, %v456_v21  ;;  %vm469_vm4 = vweird.f32 %v1113_v52  ;;  %v426_v8 = vsel %vm1153_vm5, %v1107_v46, %v422_v29 }
 0x31e   :  { %802 = vrcp.f32 %v1117_v56  ;;  %v434_v17 = vmul.f32 %v1119_v57, %v1105_v45  ;;  %v462_v40 = vmul.f32 %v1067_v18, %v461_v34  ;;  %vm1165_vm8 = vmor %vm468_vm6, %vm469_vm4  ;;  %v444_v44 = vand.u32 2147483648, %v1105_v45 }
 0x31f   :  { %v465_v63 = vsub.f32 1.0, %v464_v55  ;;  %v757_v0 = vpop.permute.xlu0 %756  ;;  %v431_v18 = vsel %vm428_vm7, %v430_v39, %v426_v8  ;;  %vm439_vm11 = vweird.f32 %v1119_v57  ;;  %v414_v58 = vand.u32 2147483648, %v1117_v56  ;;  %v649_v39 = vld [vmem:[#allocation7] sm:$0xff] }
 0x320   :  { %v759_v3 = vunpack.i.h.bf16 %v757_v0  ;;  %v758_v5 = vunpack.i.l.bf16 %v757_v0  ;;  %v435_v30 = vsub.f32 1.0, %v434_v17  ;;  %vm408_vm12 = vweird.f32 %v1117_v56  ;;  %vm440_vm15 = vmor %vm438_vm13, %vm439_vm11 }
 0x321   :  { %v466_v22 = vmul.f32 %v1113_v52, %v465_v63  ;;  %v412_v55 = vand.u32 2147483647, %v1117_v56  ;;  %v432_v59 = vmul.f32 %v1063_v4, %v431_v18  ;;  %v415_v4 = vor.u32 1.1754944e-38, %v414_v58 }
 0x322   :  { %539 = vmatpush.msra.mxu2 %v758_v5  ;;  %574 = vmatpush.msra.mxu3 %v759_v3  ;;  %v436_v10 = vmul.f32 %v1119_v57, %v435_v30  ;;  %v445_v1 = vor.u32 1.1754944e-38, %v444_v44  ;;  %vm443_vm4 = vcmp.eq.f32.partialorder %v442_v61, 8.507059e+37  ;;  %vm646_vm13 = vcmask 195584  }
 0x323   :  { %v467_v16 = vadd.f32 %v1113_v52, %v466_v22  ;;  %vm413_vm2 = vcmp.eq.f32.partialorder %v412_v55, 8.507059e+37 }
 0x324   :  { %v1138_v23 = vpop.eup %802  ;;  %v437_v53 = vadd.f32 %v1119_v57, %v436_v10 }
 0x325   :  { %v404_v31 = vmul.f32 %v1138_v23, %v1117_v56  ;;  %v767_v32 = vpop.permute.xlu2 %766  ;;  %v471_v46 = vsel %vm1165_vm8, %v1113_v52, %v467_v16  ;;  %vm409_vm10 = vweird.f32 %v1138_v23 }
 0x326   :  { %v768_v36 = vunpack.i.l.bf16 %v767_v32  ;;  %v769_v14 = vunpack.i.h.bf16 %v767_v32  ;;  %v476_v52 = vsel %vm473_vm9, %v475_v43, %v471_v46  ;;  %vm1185_vm14 = vmor %vm408_vm12, %vm409_vm10  ;;  %v441_v0 = vsel %vm440_vm15, %v1119_v57, %v437_v53 }
 0x327   :  { %v405_v13 = vsub.f32 1.0, %v404_v31  ;;  %v477_v63 = vmul.f32 %v1073_v25, %v476_v52  ;;  %v446_v2 = vsel %vm443_vm4, %v445_v1, %v441_v0 }
 0x328   :  { %609 = vmatpush.msra.mxu0 %v768_v36  ;;  %v447_v5 = vmul.f32 %v1071_v24, %v446_v2 }
 0x329   :  { %v406_v15 = vmul.f32 %v1138_v23, %v405_v13 }
 0x32a   :  { %610 = vmatpush.msra.mxu0 %v769_v14 }
 0x32b   :  { %731 = vmatmul.msk.f32.vlgmr.msra.gmra.mxu0 %vm285_vm3, %v462_v40  ;;  %v407_v48 = vadd.f32 %v1138_v23, %v406_v15  ;;  %v651_v15 = vld [vmem:[#allocation7 + $0x10] sm:$0xff]  ;;  %v650_v40 = vld [vmem:[#allocation7 + $0x8] sm:$0xff] }
 0x32c   :  { %v762_v47 = vpop.permute.xlu1 %761 }
 0x32d   :  { %v772_v49 = vpop.permute.xlu2 %771  ;;  %v764_v50 = vunpack.i.h.bf16 %v762_v47  ;;  %v763_v51 = vunpack.i.l.bf16 %v762_v47  ;;  %v411_v56 = vsel %vm1185_vm14, %v1138_v23, %v407_v48 }
 0x32e   :  { %v773_v54 = vunpack.i.l.bf16 %v772_v49  ;;  %v774_v62 = vunpack.i.h.bf16 %v772_v49  ;;  %v416_v45 = vsel %vm413_vm2, %v415_v4, %v411_v56 }
 0x32f   :  { %540 = vmatpush.msra.mxu2 %v763_v51  ;;  %575 = vmatpush.msra.mxu3 %v764_v50  ;;  %v417_v3 = vmul.f32 %v1079_v28, %v416_v45 }
 0x330   :  { %504 = vmatpush.msrb.mxu1 %v773_v54  ;;  %727 = vmatmul.msk.f32.vlgmr.msra.gmra.mxu2 %vm285_vm3, %v402_v41 }
 0x331   :  { %729 = vmatmul.msk.f32.vlgmr.msra.gmra.mxu3 %vm285_vm3, %v432_v59 }
 0x332   :  { %505 = vmatpush.msrb.mxu1 %v774_v62 }
 0x333   :  { %732 = vmatmul.msk.f32.gmra.mxu0 %vm285_vm3, %v477_v63 }
 0x338   :  { %728 = vmatmul.msk.f32.gmra.mxu2 %vm285_vm3, %v417_v3 }
 0x339   :  { %730 = vmatmul.msk.f32.gmra.mxu3 %vm285_vm3, %v447_v5 }
 0x34a   :  { %v336_v7 = vpop.xlane.xlu0 %335 }
 0x34b   :  { %804 = vrcp.f32 %v336_v7  ;;  %v369_v17 = vand.u32 2147483648, %v336_v7  ;;  %v367_v20 = vand.u32 2147483647, %v336_v7  ;;  %vm363_vm6 = vweird.f32 %v336_v7 }
 0x34d   :  { %v370_v28 = vor.u32 1.1754944e-38, %v369_v17  ;;  %vm368_vm8 = vcmp.eq.f32.partialorder %v367_v20, 8.507059e+37 }
 0x351   :  { %v805_v25 = vpop.eup %804 }
 0x352   :  { %v359_v57 = vmul.f32 %v805_v25, %v336_v7  ;;  %vm364_vm5 = vweird.f32 %v805_v25 }
 0x353   :  { %vm365_vm7 = vmor %vm363_vm6, %vm364_vm5 }
 0x354   :  { %v360_v9 = vsub.f32 1.0, %v359_v57 }
 0x356   :  { %v361_v19 = vmul.f32 %v805_v25, %v360_v9 }
 0x357   :  { %v339_v21 = vpop.xlane.xlu1 %338 }
 0x358   :  { %v362_v22 = vadd.f32 %v805_v25, %v361_v19  ;;  %806 = vrcp.f32 %v339_v21  ;;  %v384_v31 = vand.u32 2147483648, %v339_v21  ;;  %v382_v33 = vand.u32 2147483647, %v339_v21 }
 0x359   :  { %vm378_vm10 = vweird.f32 %v339_v21 }
 0x35a   :  { %v366_v24 = vsel %vm365_vm7, %v805_v25, %v362_v22  ;;  %v385_v35 = vor.u32 1.1754944e-38, %v384_v31  ;;  %vm383_vm12 = vcmp.eq.f32.partialorder %v382_v33, 8.507059e+37 }
 0x35b   :  { %v371_v23 = vsel %vm368_vm8, %v370_v28, %v366_v24 }
 0x35c   :  { %v372_v26 = vmul.f32 %v1092_v37, %v371_v23 }
 0x35e   :  { %v807_v27 = vpop.eup %806  ;;  %725 = vmatmul.msk.f32.vlgmr.msrb.gmra.mxu1 %vm285_vm3, %v372_v26 }
 0x35f   :  { %v374_v29 = vmul.f32 %v807_v27, %v339_v21  ;;  %vm379_vm9 = vweird.f32 %v807_v27 }
 0x360   :  { %vm380_vm11 = vmor %vm378_vm10, %vm379_vm9 }
 0x361   :  { %v375_v30 = vsub.f32 1.0, %v374_v29 }
 0x363   :  { %v376_v32 = vmul.f32 %v807_v27, %v375_v30 }
 0x365   :  { %v377_v34 = vadd.f32 %v807_v27, %v376_v32 }
 0x367   :  { %v381_v36 = vsel %vm380_vm11, %v807_v27, %v377_v34 }
 0x368   :  { %v386_v13 = vsel %vm383_vm12, %v385_v35, %v381_v36 }
 0x369   :  { %v387_v16 = vmul.f32 %v1096_v11, %v386_v13  ;;  %v652_v11 = vld [vmem:[#allocation7 + $0x18] sm:$0xff] }
 0x36a   :  { %674 = vmatpush.msra.mxu1 %v652_v11 }
 0x36b   :  { %726 = vmatmul.msk.f32.gmra.mxu1 %vm285_vm3, %v387_v16 }
 0x36c   :  { %675 = vmatpush.msra.mxu1 %v651_v15 }
 0x36e   :  { %676 = vmatpush.msra.mxu1 %v650_v40 }
 0x370   :  { %677 = vmatpush.msra.mxu1 %v649_v39 }
 0x3a8   :  { %v612_v37 = vpop.f32.mrf.mxu0 }
 0x3a9   :  { %636 = vrot.lane.b32.xlu2 %v612_v37, %s920_s9 }
 0x3b0   :  { %v615_v38 = vpop.f32.mrf.mxu0 }
 0x3b1   :  { %638 = vrot.lane.b32.xlu1 %v615_v38, %s920_s9 }
 0x3b3   :  { %v542_v12 = vpop.f32.mrf.mxu2 }
 0x3b4   :  { %620 = vrot.lane.b32.xlu2 %v542_v12, %s912_s24  ;;  %v577_v14 = vpop.f32.mrf.mxu3 }
 0x3bb   :  { %v545_v8 = vpop.f32.mrf.mxu2 }
 0x3bc   :  { %628 = vrot.lane.b32.xlu2 %v577_v14, %s921_s10  ;;  %622 = vrot.lane.b32.xlu0 %v545_v8, %s912_s24  ;;  %v580_v10 = vpop.f32.mrf.mxu3 }
 0x3c4   :  { %630 = vrot.lane.b32.xlu2 %v580_v10, %s921_s10 }
 0x3cc   :  { %653 = vrot.lane.b32.xlu2 %v972_v6, %s922_s11 }
 0x3db   :  { %v507_v43 = vpop.f32.mrf.mxu1 }
 0x3e8   :  { %v510_v6 = vpop.f32.mrf.mxu1 }
 0x403   :  { %v637_v41 = vpop.permute.xlu2 %636 }
 0x40e   :  { %v621_v42 = vpop.permute.xlu2 %620 }
 0x40f   :  { %v642_v44 = vsel %vm136_vm1, %v507_v43, %v621_v42 }
 0x416   :  { %v629_v46 = vpop.permute.xlu2 %628 }
 0x417   :  { %v644_v18 = vsel %vm285_vm3, %v642_v44, %v629_v46 }
 0x418   :  { %v647_v47 = vsel %vm646_vm13, %v644_v18, %v637_v41 }
 0x419   :  { %733 = vmatmul.msk.f32.vlgmr.msra.gmra.mxu1 %vm75_vm0, %v647_v47 }
 0x41e   :  { %v631_v58 = vpop.permute.xlu2 %630 }
 0x423   :  { %v639_v50 = vpop.permute.xlu1 %638 }
 0x426   :  { %v654_v54 = vpop.permute.xlu2 %653 }
 0x42e   :  { %v623_v48 = vpop.permute.xlu0 %622 }
 0x42f   :  { %v643_v49 = vsel %vm136_vm1, %v510_v6, %v623_v48 }
 0x430   :  { %v645_v51 = vsel %vm285_vm3, %v643_v49, %v631_v58 }
 0x431   :  { %v648_v53 = vsel %vm646_vm13, %v645_v51, %v639_v50 }
 0x432   :  { %734 = vmatmul.msk.f32.gmra.mxu1 %vm75_vm0, %v648_v53 }
 0x496   :  { %v679_v52 = vpop.f32.mrf.mxu1 }
 0x497   :  { %v680_v55 = vadd.f32 %v679_v52, %v654_v54 }
 0x499   :  { %685 = vst.msk [vmem:[#allocation8] sm:$0xff] %vm75_vm0, %v680_v55 }
 0x4af   :  { %v682_v59 = vpop.f32.mrf.mxu1 }
 0x4b0   :  { %v683_v60 = vadd.f32 %v682_v59, %v654_v54 }
 0x4b2   :  { %686 = vst.msk [vmem:[#allocation8 + $0x8] sm:$0xff] %vm75_vm0, %v683_v60 }
 0x4b3   :  { %699 = dma.vmem_to_hbm [thread:$0]  %s692_s13, 256, %s694_s16, [#allocation4], %s911_s23, %s911_s23, %s912_s24  }
 0x4b4   :  { %908 = dma.done.wait [#allocation4], 256  }
 0x4b5   :  { %909 = vsyncadd [#allocation4], 4294967040 }
 0x4b6   :  { %704 = vsyncpa [#allocation3], 1 }
 0x4b7   :  { %705 = vsyncpa [#allocation6], 1 }
 0x4b8   :  { %706 = vsyncpa [#allocation4], 1 }

</bundles_post_ra>
